<compile_context>
chip_gen: v6e
topology: v6e:2x2x1
jax: 0.10.0
libtpu: 0.0.40
codegen_flags: <defaults>
</compile_context>

<pallas_src>
import math

import jax
import jax.numpy as jnp
from jax.experimental import pallas as pl
from jax.experimental.pallas import tpu as pltpu

FREQ_EMBED_SIZE = 256
HIDDEN_SIZE = 128
SCALE = 1000.0


def _round_up(x, m):
    return (x + m - 1) // m * m


def _timestep_embedding_kernel(t_ref, f_ref, ws_ref, wc_ref, b_ref, o_ref):
    # t_ref : (TILE_B, 1)        f32   -- timesteps (one per row)
    # f_ref : (1, half)          f32   -- precomputed scale * freqs
    # ws_ref: (half, hidden)           -- weight.T rows matching sin(args)
    # wc_ref: (half, hidden)           -- weight.T rows matching cos(args)
    # b_ref : (1, hidden)        f32
    args = t_ref[...] * f_ref[...]                      # (TILE_B, half), broadcast

    # Split matmul == Linear(concat([sin, cos])) without any lane-axis concatenate.
    h = jnp.dot(jnp.sin(args), ws_ref[...], preferred_element_type=jnp.float32)
    h = h + jnp.dot(jnp.cos(args), wc_ref[...], preferred_element_type=jnp.float32)
    h = h + b_ref[...]

    o_ref[...] = h * jax.nn.sigmoid(h)                  # SiLU (exact sigmoid)


def timestep_embedding(timesteps, weight, bias, *, scale=SCALE,
                       tile_b=256, param_dtype=jnp.float32):
    """timesteps: (B,); weight: (hidden, freq) torch nn.Linear layout; bias: (hidden,)."""
    hidden, freq = weight.shape
    half = freq // 2
    B = timesteps.shape[0]

    # Pad batch to a multiple of 8 (f32 sublane tile) and pick a row tile.
    b_pad = _round_up(B, 8)
    if b_pad <= tile_b:
        tile_b = b_pad
    else:
        b_pad = _round_up(b_pad, tile_b)
    grid = (b_pad // tile_b,)

    t2d = jnp.zeros((b_pad, 1), jnp.float32).at[:B, 0].set(
        timesteps.astype(jnp.float32))

    # Hoisted constant: scale * exp(-log(10000) * arange(half) / (half - 1)), (1, half).
    freqs = scale * jnp.exp(
        (-math.log(10000.0) / (half - 1)) * jnp.arange(half, dtype=jnp.float32))
    freqs = freqs.reshape(1, half)

    # Pre-transpose and split the weight for the sin / cos halves of the embedding.
    w_t = weight.T.astype(param_dtype)                  # (freq, hidden)
    w_sin = w_t[:half]                                  # (half, hidden)
    w_cos = w_t[half:]                                  # (half, hidden)
    b2d = bias.reshape(1, hidden).astype(jnp.float32)

    out = pl.pallas_call(
        _timestep_embedding_kernel,
        out_shape=jax.ShapeDtypeStruct((b_pad, hidden), jnp.float32),
        grid_spec=pltpu.PrefetchScalarGridSpec(
            num_scalar_prefetch=0,
            grid=grid,
            in_specs=[
                pl.BlockSpec((tile_b, 1), lambda i: (i, 0)),          # timesteps
                pl.BlockSpec((1, half), lambda i: (0, 0)),            # scale*freqs
                pl.BlockSpec((half, hidden), lambda i: (0, 0)),       # W_sin (resident)
                pl.BlockSpec((half, hidden), lambda i: (0, 0)),       # W_cos (resident)
                pl.BlockSpec((1, hidden), lambda i: (0, 0)),          # bias
            ],
            out_specs=pl.BlockSpec((tile_b, hidden), lambda i: (i, 0)),
        ),
        compiler_params=pltpu.CompilerParams(
            dimension_semantics=("parallel",),   # shards B tiles across TCs on v7x
        ),
    )(t2d, freqs, w_sin, w_cos, b2d)

    return out[:B]


def _reference(timesteps, weight, bias, scale=SCALE):
    """Pure-JAX mirror of the PyTorch forward (f32)."""
    hidden, freq = weight.shape
    half = freq // 2
    freqs = jnp.exp(-math.log(10000.0)
                    * jnp.arange(half, dtype=jnp.float32) / (half - 1))
    args = scale * timesteps[:, None] * freqs[None, :]
    emb = jnp.concatenate([jnp.sin(args), jnp.cos(args)], axis=-1)
    h = emb @ weight.T + bias[None, :]
    return h * jax.nn.sigmoid(h)


if __name__ == "__main__":
    key = jax.random.PRNGKey(0)
    k_t, k_w, k_b = jax.random.split(key, 3)

    B = 8
    timesteps = jax.random.uniform(k_t, (B,), dtype=jnp.float32)  # in [0, 1)

    # torch nn.Linear init layout: weight (hidden, freq), bias (hidden,)
    bound = 1.0 / math.sqrt(FREQ_EMBED_SIZE)
    weight = jax.random.uniform(k_w, (HIDDEN_SIZE, FREQ_EMBED_SIZE),
                                minval=-bound, maxval=bound, dtype=jnp.float32)
    bias = jax.random.uniform(k_b, (HIDDEN_SIZE,),
                              minval=-bound, maxval=bound, dtype=jnp.float32)

    out = timestep_embedding(timesteps, weight, bias)
    out = jax.block_until_ready(out)

    ref = _reference(timesteps, weight, bias)
    assert out.shape == (B, HIDDEN_SIZE)
    assert jnp.allclose(out, ref, atol=1e-4, rtol=1e-4)

    print("KERNEL_OK")
</pallas_src>

<mosaic_0001>
module attributes {stable_mosaic.version = 11 : i64} {
  func.func @_timestep_embedding_kernel(%arg0: i32, %arg1: memref<8x1xf32, #tpu.memory_space<vmem>>, %arg2: memref<1x128xf32, #tpu.memory_space<vmem>>, %arg3: memref<128x128xf32, #tpu.memory_space<vmem>>, %arg4: memref<128x128xf32, #tpu.memory_space<vmem>>, %arg5: memref<1x128xf32, #tpu.memory_space<vmem>>, %arg6: memref<8x128xf32, #tpu.memory_space<vmem>>) attributes {dimension_semantics = [#tpu.dimension_semantics<parallel>], iteration_bounds = array<i64: 1>, scalar_prefetch = 0 : i64, scratch_operands = 0 : i64, tpu.core_type = #tpu.core_type<tc>, window_params = [{transform_indices = @transform_0, window_bounds = array<i64: 8, 1>}, {pipeline_mode = #tpu.pipeline_mode<synchronous>, transform_indices = @transform_1, window_bounds = array<i64: 1, 128>}, {pipeline_mode = #tpu.pipeline_mode<synchronous>, transform_indices = @transform_2, window_bounds = array<i64: 128, 128>}, {pipeline_mode = #tpu.pipeline_mode<synchronous>, transform_indices = @transform_3, window_bounds = array<i64: 128, 128>}, {pipeline_mode = #tpu.pipeline_mode<synchronous>, transform_indices = @transform_4, window_bounds = array<i64: 1, 128>}, {transform_indices = @transform_5, window_bounds = array<i64: 8, 128>}]} {
    %c0 = arith.constant 0 : index
    %c0_0 = arith.constant 0 : index
    %0 = vector.load %arg1[%c0, %c0_0] : memref<8x1xf32, #tpu.memory_space<vmem>>, vector<8x1xf32>
    %c0_1 = arith.constant 0 : index
    %c0_2 = arith.constant 0 : index
    %1 = vector.load %arg2[%c0_1, %c0_2] : memref<1x128xf32, #tpu.memory_space<vmem>>, vector<1x128xf32>
    %2 = vector.broadcast %0 : vector<8x1xf32> to vector<8x128xf32>
    %3 = vector.broadcast %1 : vector<1x128xf32> to vector<8x128xf32>
    %4 = arith.mulf %2, %3 : vector<8x128xf32>
    %5 = math.sin %4 : vector<8x128xf32>
    %c0_3 = arith.constant 0 : index
    %c0_4 = arith.constant 0 : index
    %6 = vector.load %arg3[%c0_3, %c0_4] : memref<128x128xf32, #tpu.memory_space<vmem>>, vector<128x128xf32>
    %cst = arith.constant dense<0.000000e+00> : vector<8x128xf32>
    %7 = tpu.matmul %5, %6, %cst {dimension_numbers = #tpu.dot_dimension_numbers<[1], [0], [0], [1], [0, 0, 1, 1], [], []>} : vector<8x128xf32>, vector<128x128xf32>, vector<8x128xf32> -> vector<8x128xf32>
    %8 = math.cos %4 : vector<8x128xf32>
    %c0_5 = arith.constant 0 : index
    %c0_6 = arith.constant 0 : index
    %9 = vector.load %arg4[%c0_5, %c0_6] : memref<128x128xf32, #tpu.memory_space<vmem>>, vector<128x128xf32>
    %cst_7 = arith.constant dense<0.000000e+00> : vector<8x128xf32>
    %10 = tpu.matmul %8, %9, %cst_7 {dimension_numbers = #tpu.dot_dimension_numbers<[1], [0], [0], [1], [0, 0, 1, 1], [], []>} : vector<8x128xf32>, vector<128x128xf32>, vector<8x128xf32> -> vector<8x128xf32>
    %11 = arith.addf %7, %10 : vector<8x128xf32>
    %c0_8 = arith.constant 0 : index
    %c0_9 = arith.constant 0 : index
    %12 = vector.load %arg5[%c0_8, %c0_9] : memref<1x128xf32, #tpu.memory_space<vmem>>, vector<1x128xf32>
    %13 = vector.broadcast %12 : vector<1x128xf32> to vector<8x128xf32>
    %14 = arith.addf %11, %13 : vector<8x128xf32>
    %15 = arith.negf %14 : vector<8x128xf32>
    %16 = math.exp %15 : vector<8x128xf32>
    %cst_10 = arith.constant 1.000000e+00 : f32
    %17 = vector.broadcast %cst_10 : f32 to vector<8x128xf32>
    %18 = arith.addf %17, %16 : vector<8x128xf32>
    %19 = arith.divf %17, %18 : vector<8x128xf32>
    %20 = arith.mulf %14, %19 : vector<8x128xf32>
    %c0_11 = arith.constant 0 : index
    %c0_12 = arith.constant 0 : index
    %21 = vector.load %arg6[%c0_11, %c0_12] : memref<8x128xf32, #tpu.memory_space<vmem>>, vector<8x128xf32>
    tpu.vector_store %arg6[%c0_11, %c0_12], %20 {strides = array<i32>} : memref<8x128xf32, #tpu.memory_space<vmem>>, vector<8x128xf32>,
    return
  }
  func.func @transform_0(%arg0: i32) -> (i32, i32) {
    %c0_i32 = arith.constant 0 : i32
    %c0_i32_0 = arith.constant 0 : i32
    return %arg0, %c0_i32 : i32, i32
  }
  func.func @transform_1(%arg0: i32) -> (i32, i32) {
    %c0_i32 = arith.constant 0 : i32
    %c0_i32_0 = arith.constant 0 : i32
    %c0_i32_1 = arith.constant 0 : i32
    return %c0_i32, %c0_i32_0 : i32, i32
  }
  func.func @transform_2(%arg0: i32) -> (i32, i32) {
    %c0_i32 = arith.constant 0 : i32
    %c0_i32_0 = arith.constant 0 : i32
    %c0_i32_1 = arith.constant 0 : i32
    return %c0_i32, %c0_i32_0 : i32, i32
  }
  func.func @transform_3(%arg0: i32) -> (i32, i32) {
    %c0_i32 = arith.constant 0 : i32
    %c0_i32_0 = arith.constant 0 : i32
    %c0_i32_1 = arith.constant 0 : i32
    return %c0_i32, %c0_i32_0 : i32, i32
  }
  func.func @transform_4(%arg0: i32) -> (i32, i32) {
    %c0_i32 = arith.constant 0 : i32
    %c0_i32_0 = arith.constant 0 : i32
    %c0_i32_1 = arith.constant 0 : i32
    return %c0_i32, %c0_i32_0 : i32, i32
  }
  func.func @transform_5(%arg0: i32) -> (i32, i32) {
    %c0_i32 = arith.constant 0 : i32
    %c0_i32_0 = arith.constant 0 : i32
    return %arg0, %c0_i32 : i32, i32
  }
}

</mosaic_0001>

<bundles_post_ra>
// kernel: tpu_custom_call.1
= control target key start
LH: loop header
LB: loop body
LE: loop exit
PB: predicated region body
PF: predicated region fallthrough
CT: control target
= control target key end

     0   :  { %10 = vsyncpa [#allocation3], 0  ;;  %s799_s0 = inlined_call_operand.vmem [shape: f32[8,1], index: 0, kind: input, shape index: {}]   ;;  %s800_s1 = inlined_call_operand.vmem [shape: f32[1,128], index: 1, kind: input, shape index: {}]   ;;  %s801_s2 = inlined_call_operand.hbm [shape: f32[128,128], index: 2, kind: input, shape index: {}]   ;;  %s802_s3 = inlined_call_operand.hbm [shape: f32[128,128], index: 3, kind: input, shape index: {}]   ;;  %s803_s4 = inlined_call_operand.vmem [shape: f32[1,128], index: 4, kind: input, shape index: {}]   ;;  %s804_s5 = inlined_call_operand.hbm [shape: f32[8,128], index: 5, kind: output, shape index: {}]  }
   0x1   :  { %11 = vsyncpa [#allocation6], 0 }
   0x2   :  { %12 = vsyncpa [#allocation4], 0  ;;  %s682_s18 = smov [#allocation2]  }
   0x3   :  { %s22_s19 = sshll.u32 %s682_s18, 4  ;;  %s23_s19 = int_to_ptr.vmem [resolvable:$true] %s22_s19 }
   0x4   :  { %s624_s20 = scalar_lea.vmem %s23_s19, 2048  ;;  %p629_p1 = scmp.lt.s32.totalorder %s23_s19, %s23_s19 }
   0x5   :  { %p625_p0 = scmp.ne.s32.totalorder %s23_s19, %s624_s20  ;;  %p630_p2 = scmp.lt.s32.totalorder %s624_s20, %s624_s20 }
   0x7   :  { %p631_p3 = por %p630_p2, %p629_p1 }
   0x9   :  { %p632_p4 = pnand %p631_p3, %p625_p0 }
   0xb   :  { %635 = shalt.err (!%p632_p4)
}
   0xc   :  { %s683_s21 = smov 128   ;;  %s684_s22 = smov 8  }
   0xd   :  { %28 = dma.hbm_to_vmem [thread:$0]  %s801_s2, 2048, %s23_s19, [#allocation3], %s683_s21, %s683_s21, %s684_s22  }
   0xe   :  { %s685_s25 = smov [#allocation5]  }
   0xf   :  { %s34_s26 = sshll.u32 %s685_s25, 4  ;;  %s35_s26 = int_to_ptr.vmem [resolvable:$true] %s34_s26 }
  0x10   :  { %s644_s27 = scalar_lea.vmem %s35_s26, 2048  ;;  %p649_p6 = scmp.lt.s32.totalorder %s35_s26, %s35_s26 }
  0x11   :  { %p645_p5 = scmp.ne.s32.totalorder %s35_s26, %s644_s27  ;;  %p650_p7 = scmp.lt.s32.totalorder %s644_s27, %s644_s27 }
  0x13   :  { %p651_p8 = por %p650_p7, %p649_p6 }
  0x15   :  { %p652_p9 = pnand %p651_p8, %p645_p5 }
  0x17   :  { %655 = shalt.err (!%p652_p9)
}
  0x18   :  { %40 = dma.hbm_to_vmem [thread:$0]  %s802_s3, 2048, %s35_s26, [#allocation6], %s683_s21, %s683_s21, %s684_s22  }
  0x19   :  { %676 = dma.done.wait [#allocation3], 2048  }
  0x1a   :  { %677 = vsyncadd [#allocation3], 4294965248 }
  0x1b   :  { %678 = dma.done.wait [#allocation6], 2048  }
  0x1c   :  { %679 = vsyncadd [#allocation6], 4294965248  ;;  %v686_v0 = vmov 0   ;;  %v49_v1 = vld [vmem:[%s799_s0] sm:$0xff]  ;;  %v687_v2 = vmov 0.0   ;;  %v301_v3 = vld [vmem:[#allocation5 + $0x78] sm:$0xff] }
  0x1d   :  { %607 = vset.pattern.permute.xlu0 %v686_v0  ;;  %519 = vmatprep.subr.mxu0 %v687_v2  ;;  %v182_v4 = vld [vmem:[#allocation2 + $0x78] sm:$0xff]  ;;  %v300_v5 = vld [vmem:[#allocation5 + $0x70] sm:$0xff]  ;;  %v299_v7 = vld [vmem:[#allocation5 + $0x68] sm:$0xff]  ;;  %vm688_vm0 = vmmov 0   ;;  %v689_v48 = vmov 683565275  }
  0x1e   :  { %53 = vperm.xlu0 %607, %v49_v1   ;;  %554 = vmatprep.subr.mxu1 %v687_v2  ;;  %v181_v6 = vld [vmem:[#allocation2 + $0x70] sm:$0xff]  ;;  %v180_v8 = vld [vmem:[#allocation2 + $0x68] sm:$0xff]  ;;  %v298_v9 = vld [vmem:[#allocation5 + $0x60] sm:$0xff]  ;;  %v690_v50 = vmov 2475754826   ;;  %s695_s7 = smov [#allocation7]  }
  0x1f   :  { %520 = vmatpush3.msra.mxu0 %v301_v3  ;;  %555 = vmatpush3.msra.mxu1 %v182_v4  ;;  %v179_v10 = vld [vmem:[#allocation2 + $0x60] sm:$0xff]  ;;  %v297_v11 = vld [vmem:[#allocation5 + $0x58] sm:$0xff]  ;;  %v296_v13 = vld [vmem:[#allocation5 + $0x50] sm:$0xff]  ;;  %v691_v53 = vmov 2131351028   ;;  %s464_s8 = sshll.u32 %s695_s7, 4  ;;  %s465_s8 = int_to_ptr.vmem [resolvable:$true] %s464_s8 }
  0x20   :  { %521 = vmatprep.subr.mxu0 %v687_v2  ;;  %556 = vmatprep.subr.mxu1 %v687_v2  ;;  %v178_v12 = vld [vmem:[#allocation2 + $0x58] sm:$0xff]  ;;  %v177_v14 = vld [vmem:[#allocation2 + $0x50] sm:$0xff]  ;;  %v295_v15 = vld [vmem:[#allocation5 + $0x48] sm:$0xff]  ;;  %v692_v56 = vmov 2102212464   ;;  %s656_s9 = scalar_lea.vmem %s465_s8, 128  ;;  %p661_p11 = scmp.lt.s32.totalorder %s465_s8, %s465_s8 }
  0x21   :  { %522 = vmatpush3.msra.mxu0 %v300_v5  ;;  %557 = vmatpush3.msra.mxu1 %v181_v6  ;;  %v176_v16 = vld [vmem:[#allocation2 + $0x48] sm:$0xff]  ;;  %v294_v17 = vld [vmem:[#allocation5 + $0x40] sm:$0xff]  ;;  %v293_v19 = vld [vmem:[#allocation5 + $0x38] sm:$0xff]  ;;  %v693_v59 = vmov 920167782   ;;  %p657_p10 = scmp.ne.s32.totalorder %s465_s8, %s656_s9  ;;  %p662_p12 = scmp.lt.s32.totalorder %s656_s9, %s656_s9 }
  0x22   :  { %523 = vmatprep.subr.mxu0 %v687_v2  ;;  %558 = vmatprep.subr.mxu1 %v687_v2  ;;  %v175_v18 = vld [vmem:[#allocation2 + $0x40] sm:$0xff]  ;;  %v174_v20 = vld [vmem:[#allocation2 + $0x38] sm:$0xff]  ;;  %v292_v21 = vld [vmem:[#allocation5 + $0x30] sm:$0xff]  ;;  %v694_v62 = vmov 1326507024  }
  0x23   :  { %524 = vmatpush3.msra.mxu0 %v299_v7  ;;  %559 = vmatpush3.msra.mxu1 %v180_v8  ;;  %v173_v22 = vld [vmem:[#allocation2 + $0x30] sm:$0xff]  ;;  %v291_v23 = vld [vmem:[#allocation5 + $0x28] sm:$0xff]  ;;  %v290_v25 = vld [vmem:[#allocation5 + $0x20] sm:$0xff]  ;;  %p663_p13 = por %p662_p12, %p661_p11 }
  0x24   :  { %525 = vmatprep.subr.mxu0 %v687_v2  ;;  %560 = vmatprep.subr.mxu1 %v687_v2  ;;  %v172_v24 = vld [vmem:[#allocation2 + $0x28] sm:$0xff]  ;;  %v171_v26 = vld [vmem:[#allocation2 + $0x20] sm:$0xff]  ;;  %v289_v27 = vld [vmem:[#allocation5 + $0x18] sm:$0xff] }
  0x25   :  { %526 = vmatpush3.msra.mxu0 %v298_v9  ;;  %561 = vmatpush3.msra.mxu1 %v179_v10  ;;  %v170_v28 = vld [vmem:[#allocation2 + $0x18] sm:$0xff]  ;;  %v288_v29 = vld [vmem:[#allocation5 + $0x10] sm:$0xff]  ;;  %v287_v31 = vld [vmem:[#allocation5 + $0x8] sm:$0xff]  ;;  %p664_p0 = pnand %p663_p13, %p657_p10 }
  0x26   :  { %527 = vmatprep.subr.mxu0 %v687_v2  ;;  %562 = vmatprep.subr.mxu1 %v687_v2  ;;  %v169_v30 = vld [vmem:[#allocation2 + $0x10] sm:$0xff]  ;;  %v168_v32 = vld [vmem:[#allocation2 + $0x8] sm:$0xff]  ;;  %v286_v33 = vld [vmem:[#allocation5] sm:$0xff] }
  0x27   :  { %528 = vmatpush3.msra.mxu0 %v297_v11  ;;  %563 = vmatpush3.msra.mxu1 %v178_v12  ;;  %v167_v34 = vld [vmem:[#allocation2] sm:$0xff] }
  0x28   :  { %529 = vmatprep.subr.mxu0 %v687_v2  ;;  %564 = vmatprep.subr.mxu1 %v687_v2  ;;  %v474_v35 = vld [vmem:[%s800_s1] ss:$0 sm:$0xff] }
  0x29   :  { %530 = vmatpush3.msra.mxu0 %v296_v13  ;;  %565 = vmatpush3.msra.mxu1 %v177_v14 }
  0x2a   :  { %531 = vmatprep.subr.mxu0 %v687_v2  ;;  %566 = vmatprep.subr.mxu1 %v687_v2 }
  0x2b   :  { %532 = vmatpush3.msra.mxu0 %v295_v15  ;;  %567 = vmatpush3.msra.mxu1 %v176_v16 }
  0x2c   :  { %533 = vmatprep.subr.mxu0 %v687_v2  ;;  %568 = vmatprep.subr.mxu1 %v687_v2 }
  0x2d   :  { %534 = vmatpush3.msra.mxu0 %v294_v17  ;;  %569 = vmatpush3.msra.mxu1 %v175_v18 }
  0x2e   :  { %535 = vmatprep.subr.mxu0 %v687_v2  ;;  %570 = vmatprep.subr.mxu1 %v687_v2 }
  0x2f   :  { %536 = vmatpush3.msra.mxu0 %v293_v19  ;;  %571 = vmatpush3.msra.mxu1 %v174_v20 }
  0x30   :  { %537 = vmatprep.subr.mxu0 %v687_v2  ;;  %572 = vmatprep.subr.mxu1 %v687_v2 }
  0x31   :  { %538 = vmatpush3.msra.mxu0 %v292_v21  ;;  %573 = vmatpush3.msra.mxu1 %v173_v22 }
  0x32   :  { %539 = vmatprep.subr.mxu0 %v687_v2  ;;  %574 = vmatprep.subr.mxu1 %v687_v2 }
  0x33   :  { %540 = vmatpush3.msra.mxu0 %v291_v23  ;;  %575 = vmatpush3.msra.mxu1 %v172_v24 }
  0x34   :  { %541 = vmatprep.subr.mxu0 %v687_v2  ;;  %576 = vmatprep.subr.mxu1 %v687_v2 }
  0x35   :  { %542 = vmatpush3.msra.mxu0 %v290_v25  ;;  %577 = vmatpush3.msra.mxu1 %v171_v26 }
  0x36   :  { %543 = vmatprep.subr.mxu0 %v687_v2  ;;  %578 = vmatprep.subr.mxu1 %v687_v2 }
  0x37   :  { %544 = vmatpush3.msra.mxu0 %v289_v27  ;;  %579 = vmatpush3.msra.mxu1 %v170_v28 }
  0x38   :  { %545 = vmatprep.subr.mxu0 %v687_v2  ;;  %580 = vmatprep.subr.mxu1 %v687_v2 }
  0x39   :  { %546 = vmatpush3.msra.mxu0 %v288_v29  ;;  %581 = vmatpush3.msra.mxu1 %v169_v30 }
  0x3a   :  { %547 = vmatprep.subr.mxu0 %v687_v2  ;;  %582 = vmatprep.subr.mxu1 %v687_v2 }
  0x3b   :  { %548 = vmatpush3.msra.mxu0 %v287_v31  ;;  %583 = vmatpush3.msra.mxu1 %v168_v32 }
  0x3c   :  { %549 = vmatprep.subr.mxu0 %v687_v2  ;;  %584 = vmatprep.subr.mxu1 %v687_v2 }
  0x3d   :  { %550 = vmatpush3.msra.mxu0 %v286_v33  ;;  %551 = vmatprep.mubr.msk.f32.mxu0 %vm688_vm0, %v687_v2 }
  0x3e   :  { %585 = vmatpush3.msra.mxu1 %v167_v34  ;;  %586 = vmatprep.mubr.msk.f32.mxu1 %vm688_vm0, %v687_v2 }
  0x99   :  { %v54_v36 = vpop.permute.xlu0 %53 }
  0x9a   :  { %v772_v37 = vmul.f32 %v474_v35, %v54_v36 }
  0x9c   :  { %v66_v38 = vand.u32 2139095040, %v772_v37  ;;  %v63_v42 = vand.u32 2147483647, %v772_v37  ;;  %vm65_vm8 = vcmp.lt.s32.totalorder %v772_v37, 0  ;;  %vm155_vm0 = vweird.f32 %v772_v37 }
  0x9e   :  { %v67_v39 = vshrl.u32 %v66_v38, 23  ;;  %v70_v45 = vand.u32 8388607, %v63_v42  ;;  %vm64_vm9 = vcmp.le.f32.partialorder %v63_v42, 0.7853982 }
  0xa0   :  { %v475_v40 = vadd.s32 4294967169, %v67_v39  ;;  %v71_v0 = vor.u32 8388608, %v70_v45 }
  0xa2   :  { %v73_v41 = vadd.s32 1, %v475_v40  ;;  %v111_v14 = vshll.u32 %v71_v0, 8 }
  0xa4   :  { %vm74_vm1 = vcmp.gt.s32.totalorder %v73_v41, 0 }
  0xa5   :  { %v75_v43 = vsel %vm74_vm1, %v73_v41, 0 }
  0xa6   :  { %v77_v44 = vand.u32 31, %v75_v43  ;;  %v76_v47 = vshrl.u32 %v75_v43, 5 }
  0xa8   :  { %v78_v46 = vsub.s32 32, %v77_v44  ;;  %v80_v49 = vshll.u32 %v689_v48, %v77_v44  ;;  %v83_v51 = vshll.u32 %v690_v50, %v77_v44  ;;  %v86_v55 = vshll.u32 %v691_v53, %v77_v44 }
  0xa9   :  { %v89_v58 = vshll.u32 %v692_v56, %v77_v44  ;;  %v92_v61 = vshll.u32 %v693_v59, %v77_v44  ;;  %vm95_vm2 = vcmp.lt.s32.totalorder %v76_v47, 1  ;;  %vm98_vm3 = vcmp.lt.s32.totalorder %v76_v47, 4 }
  0xaa   :  { %v81_v52 = vshrl.u32 %v690_v50, %v78_v46  ;;  %v84_v54 = vshrl.u32 %v691_v53, %v78_v46  ;;  %v87_v57 = vshrl.u32 %v692_v56, %v78_v46  ;;  %v90_v60 = vshrl.u32 %v693_v59, %v78_v46 }
  0xab   :  { %v93_v63 = vshrl.u32 %v694_v62, %v78_v46  ;;  %v79_v9 = vshrl.u32 %v689_v48, %v78_v46  ;;  %vm97_vm4 = vcmp.lt.s32.totalorder %v76_v47, 3  ;;  %vm96_vm5 = vcmp.lt.s32.totalorder %v76_v47, 2 }
  0xac   :  { %v82_v1 = vor.u32 %v81_v52, %v80_v49  ;;  %v85_v2 = vor.u32 %v84_v54, %v83_v51  ;;  %v88_v3 = vor.u32 %v87_v57, %v86_v55  ;;  %v91_v4 = vor.u32 %v90_v60, %v89_v58 }
  0xad   :  { %v94_v5 = vor.u32 %v93_v63, %v92_v61 }
  0xae   :  { %v100_v6 = vsel %vm98_vm3, %v88_v3, 2102212464  ;;  %v103_v7 = vsel %vm95_vm2, %v82_v1, %v85_v2  ;;  %v107_v8 = vsel %vm95_vm2, %v85_v2, %v88_v3  ;;  %v104_v10 = vsel %vm98_vm3, %v91_v4, 920167782 }
  0xaf   :  { %v108_v11 = vsel %vm98_vm3, %v94_v5, 1326507024  ;;  %v105_v12 = vsel %vm97_vm4, %v88_v3, %v104_v10  ;;  %v99_v15 = vsel %vm95_vm2, %v79_v9, %v82_v1  ;;  %v101_v16 = vsel %vm97_vm4, %v85_v2, %v100_v6  ;;  %v483_v9 = vld [vmem:[%s803_s4] ss:$0 sm:$0xff] }
  0xb0   :  { %v109_v13 = vsel %vm97_vm4, %v91_v4, %v108_v11  ;;  %v106_v17 = vsel %vm96_vm5, %v103_v7, %v105_v12  ;;  %v102_v23 = vsel %vm96_vm5, %v99_v15, %v101_v16 }
  0xb1   :  { %v110_v18 = vsel %vm96_vm5, %v107_v8, %v109_v13  ;;  %v781_v21 = vmul.u32.u64.low %v111_v14, %v106_v17  ;;  %v782_v22 = vmul.u32.u64.high %v111_v14, %v106_v17, %v781_v21  ;;  %v118_v25 = vmul.u32 %v111_v14, %v102_v23 }
  0xb2   :  { %v778_v19 = vmul.u32.u64.low %v111_v14, %v110_v18  ;;  %v779_v20 = vmul.u32.u64.high %v111_v14, %v110_v18, %v778_v19 }
  0xb3   :  { %v121_v24 = vadd.s32 1, %v782_v22 }
  0xb4   :  { %vm120_vm6 = vc.u32 %v779_v20, %v781_v21  ;;  %v119_v38 = vadd.s32 %v781_v21, %v779_v20 }
  0xb5   :  { %v122_v26 = vsel %vm120_vm6, %v121_v24, %v782_v22 }
  0xb6   :  { %v123_v27 = vadd.s32 %v122_v26, %v118_v25 }
  0xb8   :  { %v124_v28 = vadd.s32 536870912, %v123_v27 }
  0xba   :  { %v125_v29 = vshrl.u32 %v124_v28, 30 }
  0xbc   :  { %v126_v30 = vshll.u32 %v125_v29, 30  ;;  %v149_v52 = vsub.s32 4, %v125_v29 }
  0xbe   :  { %v127_v31 = vsub.s32 %v123_v27, %v126_v30  ;;  %v150_v55 = vsel %vm65_vm8, %v149_v52, %v125_v29 }
  0xbf   :  { %v152_v56 = vsel %vm64_vm9, 0, %v150_v55 }
  0xc0   :  { %v129_v32 = vsub.s32 0, %v127_v31  ;;  %v156_v57 = vadd.s32 3, %v152_v56  ;;  %v276_v58 = vand.u32 3, %v152_v56 }
  0xc2   :  { %v476_v33 = vmin.u32 %v129_v32, %v127_v31  ;;  %v157_v59 = vand.u32 3, %v156_v57  ;;  %vm281_vm10 = vcmp.eq.s32.totalorder %v276_v58, 2  ;;  %vm278_vm12 = vcmp.eq.s32.totalorder %v276_v58, 0 }
  0xc3   :  { %vm277_vm14 = vcmp.lt.s32.totalorder %v276_v58, 2 }
  0xc4   :  { %v131_v34 = vclz %v476_v33  ;;  %vm162_vm11 = vcmp.eq.s32.totalorder %v157_v59, 2  ;;  %vm159_vm13 = vcmp.eq.s32.totalorder %v157_v59, 0  ;;  %vm158_vm15 = vcmp.lt.s32.totalorder %v157_v59, 2 }
  0xc6   :  { %v477_v35 = vadd.s32 4294967294, %v131_v34 }
  0xc8   :  { %vm478_vm7 = vcmp.lt.s32.totalorder %v477_v35, 0 }
  0xc9   :  { %v134_v36 = vsel %vm478_vm7, 0, %v477_v35 }
  0xca   :  { %v135_v39 = vsub.s32 32, %v134_v36  ;;  %v139_v40 = vsub.s32 4294967266, %v134_v36  ;;  %v136_v41 = vshll.u32 %v127_v31, %v134_v36 }
  0xcc   :  { %v137_v43 = vshrl.u32 %v119_v38, %v135_v39  ;;  %v140_v44 = vadd.s32 127, %v139_v40 }
  0xce   :  { %v138_v45 = vor.u32 %v137_v43, %v136_v41  ;;  %v141_v46 = vshll.u32 %v140_v44, 23 }
  0xd0   :  { %v142_v47 = vor.u32 4788187, %v141_v46  ;;  %v145_v49 = vcvt.s32.f32 %v138_v45 }
  0xd2   :  { %v143_v48 = vand.u32 2147483647, %v142_v47 }
  0xd4   :  { %v146_v50 = vmul.f32 %v145_v49, %v143_v48 }
  0xd6   :  { %v147_v51 = vxor.u32 2147483648, %v146_v50 }
  0xd8   :  { %v148_v53 = vsel %vm65_vm8, %v147_v51, %v146_v50 }
  0xd9   :  { %v151_v54 = vsel %vm64_vm9, %v772_v37, %v148_v53 }
  0xda   :  { %608 = vcosq.f32 %v151_v54 }
  0xdb   :  { %610 = vsinq.f32 %v151_v54 }
  0xe7   :  { %v609_v60 = vpop.eup %608 }
  0xe8   :  { %v611_v61 = vpop.eup %610  ;;  %v163_v62 = vxor.u32 2147483648, %v609_v60 }
  0xe9   :  { %v160_v63 = vxor.u32 2147483648, %v611_v61 }
  0xea   :  { %v283_v0 = vsel %vm281_vm10, %v163_v62, %v611_v61  ;;  %v164_v1 = vsel %vm162_vm11, %v163_v62, %v611_v61 }
  0xeb   :  { %v280_v42 = vsel %vm278_vm12, %v609_v60, %v160_v63  ;;  %v161_v2 = vsel %vm159_vm13, %v609_v60, %v160_v63 }
  0xec   :  { %v284_v3 = vsel %vm277_vm14, %v280_v42, %v283_v0  ;;  %v165_v4 = vsel %vm158_vm15, %v161_v2, %v164_v1 }
  0xed   :  { %v285_v5 = vsel %vm155_vm0, nan, %v284_v3  ;;  %v166_v6 = vsel %vm155_vm0, nan, %v165_v4 }
  0xee   :  { %552 = vmatmul.mubr.f32.vlgmr.msra.gmra.mxu0 %v285_v5  ;;  %587 = vmatmul.mubr.f32.vlgmr.msra.gmra.mxu1 %v166_v6 }
 0x1ae   :  { %v368_v7 = vpop.f32.mrf.mxu0  ;;  %v438_v8 = vpop.f32.mrf.mxu1 }
 0x1af   :  { %v439_v10 = vadd.f32 %v438_v8, %v368_v7 }
 0x1b0   :  { %v553_v11 = vpop.f32.mrf.mxu0  ;;  %v588_v12 = vpop.f32.mrf.mxu1 }
 0x1b1   :  { %v449_v13 = vadd.f32 %v483_v9, %v439_v10 }
 0x1b3   :  { %v484_v14 = vmul.f32 -1.442695, %v449_v13 }
 0x1b5   :  { %612 = vpow2.f32 %v484_v14 }
 0x1c2   :  { %v613_v15 = vpop.eup %612 }
 0x1c3   :  { %v453_v37 = vadd.f32 1.0, %v613_v15 }
 0x1c5   :  { %614 = vrcp.f32 %v453_v37 }
 0x1d2   :  { %v615_v16 = vpop.eup %614 }
 0x1d3   :  { %v456_v17 = vmul.f32 %v615_v16, %v449_v13 }
 0x1d5   :  { %457 = vst [vmem:[#allocation7] sm:$0xff] %v456_v17 }
 0x1d6   :  { %667 = shalt.err (!%p664_p0)
}
 0x1d7   :  { %467 = dma.vmem_to_hbm [thread:$0]  %s465_s8, 128, %s804_s5, [#allocation4]  }
 0x1d8   :  { %680 = dma.done.wait [#allocation4], 128  }
 0x1d9   :  { %681 = vsyncadd [#allocation4], 4294967168 }
 0x1da   :  { %471 = vsyncpa [#allocation3], 1 }
 0x1db   :  { %472 = vsyncpa [#allocation6], 1 }
 0x1dc   :  { %473 = vsyncpa [#allocation4], 1 }

</bundles_post_ra>
